<compile_context>
chip_gen: v7x
topology: tpu7x:2x2x1
jax: 0.10.0
libtpu: 0.0.40
codegen_flags: <defaults>
</compile_context>

<pallas_src>
import jax
import jax.numpy as jnp
from jax import lax
from jax.experimental import pallas as pl
from jax.experimental.pallas import tpu as pltpu


def _round_up(x, m):
    return ((x + m - 1) // m) * m


def _choose_batch_tile(n, s):
    if n <= 8:
        return n                      # full extent (always legal)
    if s == 1:                        # already-pooled inputs: MLP-only work
        return min((n // 8) * 8, 128)
    return 8


def _choose_s_tile(s, tn, c, budget_bytes):
    """S tile: whole S if it fits the per-buffer budget, else a multiple of
    128 (ragged remainder handled by in-kernel masking)."""
    row_bytes = 4 * tn * c
    max_rows = max(budget_bytes // row_bytes, 1)
    if s <= 128 or s <= max_rows:
        return s
    return max((max_rows // 128) * 128, 128)


def _make_head_kernel(num_layers, s_total, s_tile, inv_s, eps, mask_s):
    def kernel(*refs):
        x_ref = refs[0]                                  # (tn, C, ts)
        wb_refs = refs[1:1 + 2 * num_layers]
        out_ref = refs[1 + 2 * num_layers]               # (tn, K_pad)
        acc_ref = refs[2 + 2 * num_layers]               # (tn, C) f32 scratch

        s_idx = pl.program_id(1)

        @pl.when(s_idx == 0)
        def _():
            acc_ref[...] = jnp.zeros_like(acc_ref)

        x = x_ref[...]
        if mask_s:
            # Zero out lanes that fall past the true spatial extent S.
            s_pos = s_idx * s_tile + lax.broadcasted_iota(jnp.int32, x.shape, 2)
            x = jnp.where(s_pos < s_total, x, 0.0)

        # Partial spatio-temporal sum (lane reduce; hidden under the HBM DMA).
        acc_ref[...] += jnp.sum(x, axis=-1)

        @pl.when(s_idx == pl.num_programs(1) - 1)
        def _():
            h = acc_ref[...] * inv_s                     # global average pool
            for l in range(num_layers):                  # static unroll
                w = wb_refs[2 * l][...]
                b = wb_refs[2 * l + 1][...]
                h = jnp.dot(h, w, preferred_element_type=jnp.float32) + b
                if l != num_layers - 1:
                    h = jnp.maximum(h, 0.0)              # ReLU
            # F.normalize(x, dim=-1): x / max(||x||_2, eps)
            nrm = jnp.sqrt(jnp.sum(h * h, axis=-1, keepdims=True))
            out_ref[...] = h / jnp.maximum(nrm, eps)

    return kernel


def contrastive_code_pathway(x_ncs, weights, biases, *, eps=1e-12,
                             x_tile_bytes=6 << 20):
    """Fused mean-pool + MLP + L2-normalize for one pathway.

    x_ncs:      [N, C, S] float32 (native NCTHW layout, spatial flattened to S)
    weights[l]: [c_in_pad_l, c_out_pad_l] (transposed, zero-padded to 128 lanes)
    biases[l]:  [1, c_out_pad_l]
    returns:    [N, K_pad] L2-normalized codes (padded columns are zero)
    """
    N, C, S = x_ncs.shape
    num_layers = len(weights)
    k_pad = weights[-1].shape[1]

    tn = _choose_batch_tile(N, S)
    ts = _choose_s_tile(S, tn, C, x_tile_bytes)
    mask_s = (S % ts) != 0
    grid = (pl.cdiv(N, tn), pl.cdiv(S, ts))

    in_specs = [pl.BlockSpec((tn, C, ts), lambda i, s: (i, 0, s))]
    args = [x_ncs]
    for w, b in zip(weights, biases):
        # Constant index_map -> weights/biases stay resident in VMEM.
        in_specs.append(pl.BlockSpec(w.shape, lambda i, s: (0, 0)))
        in_specs.append(pl.BlockSpec(b.shape, lambda i, s: (0, 0)))
        args.extend((w, b))

    kernel = _make_head_kernel(num_layers, S, ts, 1.0 / float(S), eps, mask_s)

    # Rough VMEM budget (double-buffered input + resident weights + output +
    # accumulator); only raises the scoped limit for large configs.
    in_block_bytes = 4 * tn * C * ts
    wb_bytes = sum(4 * int(w.size) for w in weights) \
        + sum(4 * int(b.size) for b in biases)
    vmem_limit = max(32 << 20,
                     int(1.3 * (2 * in_block_bytes + wb_bytes +
                                2 * 4 * tn * k_pad + 4 * tn * C)))

    return pl.pallas_call(
        kernel,
        out_shape=jax.ShapeDtypeStruct((N, k_pad), jnp.float32),
        grid_spec=pltpu.PrefetchScalarGridSpec(
            num_scalar_prefetch=0,
            grid=grid,
            in_specs=in_specs,
            out_specs=pl.BlockSpec((tn, k_pad), lambda i, s: (i, 0)),
            scratch_shapes=[pltpu.VMEM((tn, C), jnp.float32)],
        ),
        compiler_params=pltpu.CompilerParams(
            dimension_semantics=("parallel", "arbitrary"),
            vmem_limit_bytes=vmem_limit),
    )(*args)


class ContrastiveCodeHeadPallas:
    """JAX/Pallas re-implementation of ContrastiveCodeHead.forward."""

    def __init__(self, dim_in, dim_hidden, dim_out, num_layers, key,
                 x_tile_bytes=6 << 20):
        self.num_pathways = len(dim_in)
        self.num_layers = num_layers
        self.dim_out = dim_out
        self.x_tile_bytes = x_tile_bytes
        # PyTorch-convention params (for the reference) and padded kernel params.
        self.torch_params = []   # per pathway: [(W[out,in], b[out]), ...]
        self.kernel_w = []       # per pathway: [W_pad[in_pad, out_pad], ...]
        self.kernel_b = []       # per pathway: [b_pad[1, out_pad], ...]
        for p in range(self.num_pathways):
            cur_in = dim_in[p]
            cur_in_pad = cur_in          # layer-0 input = pooled channels (unpadded)
            layer_params, kw_list, kb_list = [], [], []
            for idx in range(num_layers):
                cur_out = dim_out if idx == num_layers - 1 else dim_hidden
                key, k1, k2 = jax.random.split(key, 3)
                bound = 1.0 / (cur_in ** 0.5)        # nn.Linear default init
                w = jax.random.uniform(k1, (cur_out, cur_in), jnp.float32,
                                       -bound, bound)
                b = jax.random.uniform(k2, (cur_out,), jnp.float32,
                                       -bound, bound)
                layer_params.append((w, b))
                out_pad = _round_up(cur_out, 128)    # lane-dense MXU / stores
                wk = jnp.zeros((cur_in_pad, out_pad), jnp.float32)
                wk = wk.at[:cur_in, :cur_out].set(w.T)
                bk = jnp.zeros((1, out_pad), jnp.float32).at[0, :cur_out].set(b)
                kw_list.append(wk)
                kb_list.append(bk)
                cur_in, cur_in_pad = cur_out, out_pad
            self.torch_params.append(layer_params)
            self.kernel_w.append(kw_list)
            self.kernel_b.append(kb_list)

    def __call__(self, inputs):
        tensor_io = not isinstance(inputs, (list, tuple))
        if tensor_io:
            inputs = [inputs]
        outputs = []
        for p, x in enumerate(inputs):
            if x.ndim >= 5:
                # NCTHW (or more trailing spatial dims): free reshape to
                # (N, C, S) -- the kernel pools in the native layout.
                n, c = x.shape[0], x.shape[1]
                x = x.reshape(n, c, -1)
            elif x.ndim == 2:
                x = x[:, :, None]        # already pooled features -> S = 1
            else:
                # TODO(synk): 3-D / 4-D inputs (Linear applied on the last dim
                # without pooling) not exercised by this config.
                raise NotImplementedError("unsupported input rank")
            x = x.astype(jnp.float32)
            out_pad = contrastive_code_pathway(
                x, self.kernel_w[p], self.kernel_b[p],
                x_tile_bytes=self.x_tile_bytes)
            outputs.append(out_pad[:, : self.dim_out])
        if tensor_io:
            return outputs[0]
        return outputs


def reference_head(inputs, torch_params, num_layers, eps=1e-12):
    """Pure-JAX reference matching the PyTorch forward."""
    outputs = []
    for p, x in enumerate(inputs):
        if x.ndim >= 5:
            x = jnp.mean(x, axis=(2, 3, 4))
        x = x.astype(jnp.float32)
        for l in range(num_layers):
            w, b = torch_params[p][l]
            x = jnp.dot(x, w.T, precision=jax.lax.Precision.HIGHEST) + b
            if l != num_layers - 1:
                x = jnp.maximum(x, 0.0)
        nrm = jnp.sqrt(jnp.sum(x * x, axis=-1, keepdims=True))
        outputs.append(x / jnp.maximum(nrm, eps))
    return outputs


if __name__ == "__main__":
    key = jax.random.PRNGKey(0)
    k0, k1, k2, k3, kparams = jax.random.split(key, 5)

    # Small SlowFast-style 2-pathway config.  S = 4*7*7 = 196 is deliberately
    # NOT a multiple of 128, and the small x_tile_bytes forces S tiling, so
    # the masked / multi-step reduction path is exercised.
    N, T, H, W = 4, 4, 7, 7
    dim_in = [16, 32]
    dim_hidden = 64
    dim_out = 32
    num_layers = 3

    # PyTorch-convention NCTHW pathway inputs.
    x0 = jax.random.normal(k0, (N, dim_in[0], T, H, W), jnp.float32)
    x1 = jax.random.normal(k1, (N, dim_in[1], T, H, W), jnp.float32)

    head = ContrastiveCodeHeadPallas(dim_in, dim_hidden, dim_out, num_layers,
                                     kparams, x_tile_bytes=32 << 10)
    outs = [jax.block_until_ready(o) for o in head([x0, x1])]

    refs = reference_head([x0, x1], head.torch_params, num_layers)
    for o, r in zip(outs, refs):
        assert o.shape == (N, dim_out), o.shape
        assert jnp.allclose(o, r, atol=1e-4, rtol=1e-4), \
            float(jnp.abs(o - r).max())
        # outputs are L2-normalized
        assert jnp.allclose(jnp.linalg.norm(o, axis=-1), 1.0, atol=1e-4)

    # Already-pooled (2-D) inputs: Linear stack + normalize, no pooling.
    y0 = jax.random.normal(k2, (N, dim_in[0]), jnp.float32)
    y1 = jax.random.normal(k3, (N, dim_in[1]), jnp.float32)
    outs2 = [jax.block_until_ready(o) for o in head([y0, y1])]
    refs2 = reference_head([y0, y1], head.torch_params, num_layers)
    for o, r in zip(outs2, refs2):
        assert o.shape == (N, dim_out), o.shape
        assert jnp.allclose(o, r, atol=1e-4, rtol=1e-4), \
            float(jnp.abs(o - r).max())

    print("KERNEL_OK")
</pallas_src>

<mosaic_0001>
module attributes {stable_mosaic.version = 11 : i64} {
  func.func @kernel(%arg0: i32, %arg1: i32, %arg2: memref<4x16x128xf32, #tpu.memory_space<vmem>>, %arg3: memref<16x128xf32, #tpu.memory_space<vmem>>, %arg4: memref<1x128xf32, #tpu.memory_space<vmem>>, %arg5: memref<128x128xf32, #tpu.memory_space<vmem>>, %arg6: memref<1x128xf32, #tpu.memory_space<vmem>>, %arg7: memref<128x128xf32, #tpu.memory_space<vmem>>, %arg8: memref<1x128xf32, #tpu.memory_space<vmem>>, %arg9: memref<4x128xf32, #tpu.memory_space<vmem>>, %arg10: memref<4x16xf32, #tpu.memory_space<vmem>>) attributes {dimension_semantics = [#tpu.dimension_semantics<parallel>, #tpu.dimension_semantics<arbitrary>], iteration_bounds = array<i64: 1, 2>, scalar_prefetch = 0 : i64, scratch_operands = 1 : i64, tpu.core_type = #tpu.core_type<tc>, window_params = [{transform_indices = @transform_0, window_bounds = array<i64: 4, 16, 128>}, {pipeline_mode = #tpu.pipeline_mode<synchronous>, transform_indices = @transform_1, window_bounds = array<i64: 16, 128>}, {pipeline_mode = #tpu.pipeline_mode<synchronous>, transform_indices = @transform_2, window_bounds = array<i64: 1, 128>}, {pipeline_mode = #tpu.pipeline_mode<synchronous>, transform_indices = @transform_3, window_bounds = array<i64: 128, 128>}, {pipeline_mode = #tpu.pipeline_mode<synchronous>, transform_indices = @transform_4, window_bounds = array<i64: 1, 128>}, {pipeline_mode = #tpu.pipeline_mode<synchronous>, transform_indices = @transform_5, window_bounds = array<i64: 128, 128>}, {pipeline_mode = #tpu.pipeline_mode<synchronous>, transform_indices = @transform_6, window_bounds = array<i64: 1, 128>}, {transform_indices = @transform_7, window_bounds = array<i64: 4, 128>}]} {
    %c0_i32 = arith.constant 0 : i32
    %0 = arith.cmpi eq, %arg1, %c0_i32 : i32
    %1 = arith.extui %0 : i1 to i32
    %c0_i32_0 = arith.constant 0 : i32
    %2 = arith.cmpi ne, %1, %c0_i32_0 : i32
    scf.if %2 {
      %cst_9 = arith.constant 0.000000e+00 : f32
      %19 = vector.broadcast %cst_9 : f32 to vector<4x16xf32>
      %c0_10 = arith.constant 0 : index
      %c0_11 = arith.constant 0 : index
      %20 = vector.load %arg10[%c0_10, %c0_11] : memref<4x16xf32, #tpu.memory_space<vmem>>, vector<4x16xf32>
      tpu.vector_store %arg10[%c0_10, %c0_11], %19 {strides = array<i32>} : memref<4x16xf32, #tpu.memory_space<vmem>>, vector<4x16xf32>,
    } else {
    }
    %c0 = arith.constant 0 : index
    %c0_1 = arith.constant 0 : index
    %c0_2 = arith.constant 0 : index
    %3 = vector.load %arg2[%c0, %c0_1, %c0_2] : memref<4x16x128xf32, #tpu.memory_space<vmem>>, vector<4x16x128xf32>
    %c128_i32 = arith.constant 128 : i32
    %4 = arith.muli %arg1, %c128_i32 : i32
    %5 = tpu.iota {dimensions = array<i32: 2>} : vector<4x16x128xi32>
    %6 = vector.broadcast %4 : i32 to vector<4x16x128xi32>
    %7 = arith.addi %6, %5 : vector<4x16x128xi32>
    %c196_i32 = arith.constant 196 : i32
    %8 = vector.broadcast %c196_i32 : i32 to vector<4x16x128xi32>
    %9 = arith.cmpi slt, %7, %8 : vector<4x16x128xi32>
    %cst = arith.constant 0.000000e+00 : f32
    %10 = vector.broadcast %cst : f32 to vector<4x16x128xf32>
    %11 = arith.select %9, %3, %10 : vector<4x16x128xi1>, vector<4x16x128xf32>
    %c0_3 = arith.constant 0 : index
    %c0_4 = arith.constant 0 : index
    %12 = vector.load %arg10[%c0_3, %c0_4] : memref<4x16xf32, #tpu.memory_space<vmem>>, vector<4x16xf32>
    %cst_5 = arith.constant dense<0.000000e+00> : vector<4x16xf32>
    %13 = vector.multi_reduction <add>, %11, %cst_5 [2] : vector<4x16x128xf32> to vector<4x16xf32>
    %14 = arith.addf %12, %13 : vector<4x16xf32>
    %c0_6 = arith.constant 0 : index
    %c0_7 = arith.constant 0 : index
    %15 = vector.load %arg10[%c0_6, %c0_7] : memref<4x16xf32, #tpu.memory_space<vmem>>, vector<4x16xf32>
    tpu.vector_store %arg10[%c0_6, %c0_7], %14 {strides = array<i32>} : memref<4x16xf32, #tpu.memory_space<vmem>>, vector<4x16xf32>,
    %c1_i32 = arith.constant 1 : i32
    %16 = arith.cmpi eq, %arg1, %c1_i32 : i32
    %17 = arith.extui %16 : i1 to i32
    %c0_i32_8 = arith.constant 0 : i32
    %18 = arith.cmpi ne, %17, %c0_i32_8 : i32
    scf.if %18 {
      %c0_9 = arith.constant 0 : index
      %c0_10 = arith.constant 0 : index
      %19 = vector.load %arg10[%c0_9, %c0_10] : memref<4x16xf32, #tpu.memory_space<vmem>>, vector<4x16xf32>
      %cst_11 = arith.constant 0.00510204071 : f32
      %20 = vector.broadcast %cst_11 : f32 to vector<4x16xf32>
      %21 = arith.mulf %19, %20 : vector<4x16xf32>
      %c0_12 = arith.constant 0 : index
      %c0_13 = arith.constant 0 : index
      %22 = vector.load %arg3[%c0_12, %c0_13] : memref<16x128xf32, #tpu.memory_space<vmem>>, vector<16x128xf32>
      %c0_14 = arith.constant 0 : index
      %c0_15 = arith.constant 0 : index
      %23 = vector.load %arg4[%c0_14, %c0_15] : memref<1x128xf32, #tpu.memory_space<vmem>>, vector<1x128xf32>
      %cst_16 = arith.constant dense<0.000000e+00> : vector<4x128xf32>
      %24 = tpu.matmul %21, %22, %cst_16 {dimension_numbers = #tpu.dot_dimension_numbers<[1], [0], [0], [1], [0, 0, 1, 1], [], []>} : vector<4x16xf32>, vector<16x128xf32>, vector<4x128xf32> -> vector<4x128xf32>
      %25 = vector.broadcast %23 : vector<1x128xf32> to vector<4x128xf32>
      %26 = arith.addf %24, %25 : vector<4x128xf32>
      %cst_17 = arith.constant 0.000000e+00 : f32
      %27 = vector.broadcast %cst_17 : f32 to vector<4x128xf32>
      %28 = arith.maximumf %26, %27 : vector<4x128xf32>
      %c0_18 = arith.constant 0 : index
      %c0_19 = arith.constant 0 : index
      %29 = vector.load %arg5[%c0_18, %c0_19] : memref<128x128xf32, #tpu.memory_space<vmem>>, vector<128x128xf32>
      %c0_20 = arith.constant 0 : index
      %c0_21 = arith.constant 0 : index
      %30 = vector.load %arg6[%c0_20, %c0_21] : memref<1x128xf32, #tpu.memory_space<vmem>>, vector<1x128xf32>
      %cst_22 = arith.constant dense<0.000000e+00> : vector<4x128xf32>
      %31 = tpu.matmul %28, %29, %cst_22 {dimension_numbers = #tpu.dot_dimension_numbers<[1], [0], [0], [1], [0, 0, 1, 1], [], []>} : vector<4x128xf32>, vector<128x128xf32>, vector<4x128xf32> -> vector<4x128xf32>
      %32 = vector.broadcast %30 : vector<1x128xf32> to vector<4x128xf32>
      %33 = arith.addf %31, %32 : vector<4x128xf32>
      %cst_23 = arith.constant 0.000000e+00 : f32
      %34 = vector.broadcast %cst_23 : f32 to vector<4x128xf32>
      %35 = arith.maximumf %33, %34 : vector<4x128xf32>
      %c0_24 = arith.constant 0 : index
      %c0_25 = arith.constant 0 : index
      %36 = vector.load %arg7[%c0_24, %c0_25] : memref<128x128xf32, #tpu.memory_space<vmem>>, vector<128x128xf32>
      %c0_26 = arith.constant 0 : index
      %c0_27 = arith.constant 0 : index
      %37 = vector.load %arg8[%c0_26, %c0_27] : memref<1x128xf32, #tpu.memory_space<vmem>>, vector<1x128xf32>
      %cst_28 = arith.constant dense<0.000000e+00> : vector<4x128xf32>
      %38 = tpu.matmul %35, %36, %cst_28 {dimension_numbers = #tpu.dot_dimension_numbers<[1], [0], [0], [1], [0, 0, 1, 1], [], []>} : vector<4x128xf32>, vector<128x128xf32>, vector<4x128xf32> -> vector<4x128xf32>
      %39 = vector.broadcast %37 : vector<1x128xf32> to vector<4x128xf32>
      %40 = arith.addf %38, %39 : vector<4x128xf32>
      %41 = arith.mulf %40, %40 : vector<4x128xf32>
      %cst_29 = arith.constant dense<0.000000e+00> : vector<4xf32>
      %42 = vector.multi_reduction <add>, %41, %cst_29 [1] : vector<4x128xf32> to vector<4xf32>
      %43 = vector.shape_cast %42 : vector<4xf32> to vector<4x1xf32>
      %44 = math.sqrt %43 : vector<4x1xf32>
      %cst_30 = arith.constant 9.99999996E-13 : f32
      %45 = vector.broadcast %cst_30 : f32 to vector<4x1xf32>
      %46 = arith.maximumf %44, %45 : vector<4x1xf32>
      %47 = vector.broadcast %46 : vector<4x1xf32> to vector<4x128xf32>
      %48 = arith.divf %40, %47 : vector<4x128xf32>
      %c0_31 = arith.constant 0 : index
      %c0_32 = arith.constant 0 : index
      %49 = vector.load %arg9[%c0_31, %c0_32] : memref<4x128xf32, #tpu.memory_space<vmem>>, vector<4x128xf32>
      tpu.vector_store %arg9[%c0_31, %c0_32], %48 {strides = array<i32>} : memref<4x128xf32, #tpu.memory_space<vmem>>, vector<4x128xf32>,
    } else {
    }
    return
  }
  func.func @transform_0(%arg0: i32, %arg1: i32) -> (i32, i32, i32) {
    %c0_i32 = arith.constant 0 : i32
    %c0_i32_0 = arith.constant 0 : i32
    return %arg0, %c0_i32, %arg1 : i32, i32, i32
  }
  func.func @transform_1(%arg0: i32, %arg1: i32) -> (i32, i32) {
    %c0_i32 = arith.constant 0 : i32
    %c0_i32_0 = arith.constant 0 : i32
    %c0_i32_1 = arith.constant 0 : i32
    return %c0_i32, %c0_i32_0 : i32, i32
  }
  func.func @transform_2(%arg0: i32, %arg1: i32) -> (i32, i32) {
    %c0_i32 = arith.constant 0 : i32
    %c0_i32_0 = arith.constant 0 : i32
    %c0_i32_1 = arith.constant 0 : i32
    return %c0_i32, %c0_i32_0 : i32, i32
  }
  func.func @transform_3(%arg0: i32, %arg1: i32) -> (i32, i32) {
    %c0_i32 = arith.constant 0 : i32
    %c0_i32_0 = arith.constant 0 : i32
    %c0_i32_1 = arith.constant 0 : i32
    return %c0_i32, %c0_i32_0 : i32, i32
  }
  func.func @transform_4(%arg0: i32, %arg1: i32) -> (i32, i32) {
    %c0_i32 = arith.constant 0 : i32
    %c0_i32_0 = arith.constant 0 : i32
    %c0_i32_1 = arith.constant 0 : i32
    return %c0_i32, %c0_i32_0 : i32, i32
  }
  func.func @transform_5(%arg0: i32, %arg1: i32) -> (i32, i32) {
    %c0_i32 = arith.constant 0 : i32
    %c0_i32_0 = arith.constant 0 : i32
    %c0_i32_1 = arith.constant 0 : i32
    return %c0_i32, %c0_i32_0 : i32, i32
  }
  func.func @transform_6(%arg0: i32, %arg1: i32) -> (i32, i32) {
    %c0_i32 = arith.constant 0 : i32
    %c0_i32_0 = arith.constant 0 : i32
    %c0_i32_1 = arith.constant 0 : i32
    return %c0_i32, %c0_i32_0 : i32, i32
  }
  func.func @transform_7(%arg0: i32, %arg1: i32) -> (i32, i32) {
    %c0_i32 = arith.constant 0 : i32
    %c0_i32_0 = arith.constant 0 : i32
    return %arg0, %c0_i32 : i32, i32
  }
}

</mosaic_0001>

<bundles_post_ra>
// kernel: tpu_custom_call.1
= control target key start
LH: loop header
LB: loop body
LE: loop exit
PB: predicated region body
PF: predicated region fallthrough
CT: control target
= control target key end

     0   :  { %s1691_s0 = inlined_call_operand.hbm [shape: f32[4,16,196], index: 0, kind: input, shape index: {}]   ;;  %s1692_s1 = inlined_call_operand.hbm [shape: f32[16,128], index: 1, kind: input, shape index: {}]   ;;  %s1693_s2 = inlined_call_operand.vmem [shape: f32[1,128], index: 2, kind: input, shape index: {}]   ;;  %s1694_s3 = inlined_call_operand.hbm [shape: f32[128,128], index: 3, kind: input, shape index: {}]   ;;  %s1695_s4 = inlined_call_operand.vmem [shape: f32[1,128], index: 4, kind: input, shape index: {}]   ;;  %s1696_s5 = inlined_call_operand.hbm [shape: f32[128,128], index: 5, kind: input, shape index: {}]   ;;  %s1697_s6 = inlined_call_operand.vmem [shape: f32[1,128], index: 6, kind: input, shape index: {}]   ;;  %s1698_s7 = inlined_call_operand.hbm [shape: f32[4,128], index: 7, kind: output, shape index: {}]  }
   0x1   :  { %1707 = sst [smem:[#allocation17_spill]] %s1695_s4 }
   0x2   :  { %1708 = sst [smem:[#allocation18_spill]] %s1697_s6 }
   0x3   :  { %1709 = sst [smem:[#allocation19_spill]] %s1698_s7 }
   0x4   :  { %12 = vsyncpa [#allocation4], 0 }
   0x5   :  { %14 = vsyncpa [#allocation4 + $0x1], 0 }
   0x6   :  { %15 = vsyncpa [#allocation7], 0 }
   0x7   :  { %16 = vsyncpa [#allocation10], 0 }
   0x8   :  { %17 = vsyncpa [#allocation5], 0  ;;  %s1395_s24 = smov 0   ;;  %s1397_s25 = smov 0  }
   0x9   :  { %s1399_s26 = smov 0   ;;  %s1401_s27 = smov 0  }
   0xa   :  { %s1403_s28 = smov 0   ;;  %s1405_s29 = smov 0  }
   0xb LB: > { %1710 = sst [smem:[#allocation16_spill]] %s1341_s29  ;;  %s1704_s30 = sadd.s32 4294967295, %s1341_s29   ;;  %s1341_s29 = sphi %s1405_s29, %s23_s29   ;;  %s1337_s28 = sphi %s1403_s28, %s1732_s28   ;;  %s1333_s27 = sphi %s1401_s27, %s1731_s27   ;;  %s1329_s26 = sphi %s1399_s26, %s1730_s26   ;;  %s1325_s25 = sphi %s1397_s25, %s1729_s25   ;;  %s1321_s24 = sphi %s1395_s24, %s1728_s24  }
   0xc   : > { %p51_p0 = scmp.ne.s32.totalorder %s1329_s26, %s1325_s25  ;;  %p52_p1 = scmp.eq.s32.totalorder %s1341_s29, 0 }
   0xd   : > { %p57_p2 = scmp.ne.s32.totalorder %s1325_s25, %s1321_s24  ;;  %p1430_p3 = scmp.eq.s32.totalorder %s1704_s30, 0 }
   0xe   : > { %p847_p4 = scmp.ge.s32.totalorder %s1341_s29, 1  ;;  %p53_p5 = por %p52_p1, %p51_p0 }
   0xf   : > { %s1711_s8 = scalar_select %p1430_p3, 1, 0 }
  0x10   : > { %p220_p6 = scmp.lt.s32.totalorder %s1341_s29, 3  ;;  %p1438_p7 = por %p1430_p3, %p57_p2 }
  0x11   : > { %s1343_s11 = smov [#allocation6]   ;;  %p1070_p11 = scmp.lt.s32.totalorder %s1341_s29, 2 }
  0x12   : > { %s1712_s9 = scalar_select %p1438_p7, 1, 0 }
  0x13   : > { %p1442_p8 = pnand %p847_p4, %p220_p6  ;;  %s232_s12 = sshll.u32 %s1343_s11, 4  ;;  %s233_s12 = int_to_ptr.vmem [resolvable:$true] %s232_s12 }
  0x14   : > { %p1455_p12 = pnand %p1070_p11, %p53_p5  ;;  %s1139_s17 = scalar_lea.hbm %s1692_s1, 256 }
  0x15   : > { %s1713_s10 = scalar_select %p1442_p8, 1, 0 }
  0x16   : > { %p1053_p9 = pneg %p1442_p8  ;;  %p1140_p13 = scmp.ne.s32.totalorder %s1692_s1, %s1139_s17 }
  0x17   : > { %s1715_s14 = scalar_select %p1455_p12, 1, 0 }
  0x18   : > { %p1450_p10 = pnand %p1053_p9, %p1430_p3  ;;  %p1146_p4 = scmp.lt.u32.totalorder %s1139_s17, %s1692_s1 }
  0x1a   : > { %p1467_p0 = pneg %p1450_p10 }
  0x1c   : > { %p1142_p1 = pnand %p1467_p0, %p1140_p13 }
  0x1e   : > { %p1143_p2 = pneg %p1142_p1 }
  0x20   : > { %p1148_p5 = pnand %p1146_p4, %p1143_p2 }
  0x22   : > { %1151 = shalt.err (!%p1148_p5)
}
  0x23   : > { %s1152_s23 = scalar_lea.vmem %s233_s12, 256  ;;  %p1160_p3 = scmp.lt.s32.totalorder %s233_s12, %s233_s12 }
  0x24   : > { %p1153_p6 = scmp.ne.s32.totalorder %s233_s12, %s1152_s23  ;;  %p1161_p7 = scmp.lt.s32.totalorder %s1152_s23, %s1152_s23 }
  0x26   : > { %p1155_p9 = pnand %p1153_p6, %p1467_p0  ;;  %p1162_p8 = por %p1161_p7, %p1160_p3 }
  0x28   : > { %p1156_p11 = pneg %p1155_p9 }
  0x2a   : > { %p1163_p12 = pnand %p1162_p8, %p1156_p11 }
  0x2c   : > { %1166 = shalt.err (!%p1163_p12)
}
  0x2d   : > { %s1344_s24 = smov 128   ;;  %s1345_s11 = smov 8  }
  0x2e   : > { %1056 = dma.hbm_to_vmem [thread:$0]  (!%p1450_p10), %s1692_s1, 256, %s233_s12, [#allocation7], %s1344_s24, %s1344_s24, %s1345_s11  }
  0x2f   : > { %s1346_s17 = smov [#allocation8]   ;;  %s1347_s19 = smov [#allocation9]  }
  0x30   : > { %s248_s18 = sshll.u32 %s1346_s17, 4  ;;  %s264_s21 = sshll.u32 %s1347_s19, 4  ;;  %s249_s18 = int_to_ptr.vmem [resolvable:$true] %s248_s18  ;;  %s265_s21 = int_to_ptr.vmem [resolvable:$true] %s264_s21 }
  0x31   : > { %s1167_s30 = scalar_lea.hbm %s1694_s3, 2048 }
  0x32   : > { %p1168_p3 = scmp.ne.s32.totalorder %s1694_s3, %s1167_s30  ;;  %p1174_p12 = scmp.lt.u32.totalorder %s1167_s30, %s1694_s3 }
  0x34   : > { %p1170_p7 = pnand %p1168_p3, %p1467_p0 }
  0x36   : > { %p1171_p8 = pneg %p1170_p7 }
  0x38   : > { %p1176_p13 = pnand %p1174_p12, %p1171_p8 }
  0x3a   : > { %1179 = shalt.err (!%p1176_p13)
}
  0x3b   : > { %s1180_s12 = scalar_lea.vmem %s249_s18, 2048  ;;  %p1188_p5 = scmp.lt.s32.totalorder %s249_s18, %s249_s18 }
  0x3c   : > { %p1181_p1 = scmp.ne.s32.totalorder %s249_s18, %s1180_s12  ;;  %p1189_p6 = scmp.lt.s32.totalorder %s1180_s12, %s1180_s12 }
  0x3e   : > { %p1183_p2 = pnand %p1181_p1, %p1467_p0  ;;  %p1190_p9 = por %p1189_p6, %p1188_p5 }
  0x40   : > { %p1184_p4 = pneg %p1183_p2 }
  0x42   : > { %p1191_p11 = pnand %p1190_p9, %p1184_p4 }
  0x44   : > { %1194 = shalt.err (!%p1191_p11)
}
  0x45   : > { %1059 = dma.hbm_to_vmem [thread:$0]  (!%p1450_p10), %s1694_s3, 2048, %s249_s18, [#allocation7], %s1344_s24, %s1344_s24, %s1345_s11  }
  0x46   : > { %s1195_s30 = scalar_lea.hbm %s1696_s5, 2048 }
  0x47   : > { %p1196_p3 = scmp.ne.s32.totalorder %s1696_s5, %s1195_s30  ;;  %p1202_p12 = scmp.lt.u32.totalorder %s1195_s30, %s1696_s5 }
  0x49   : > { %p1198_p7 = pnand %p1196_p3, %p1467_p0 }
  0x4b   : > { %p1199_p8 = pneg %p1198_p7 }
  0x4d   : > { %p1204_p13 = pnand %p1202_p12, %p1199_p8 }
  0x4f   : > { %1207 = shalt.err (!%p1204_p13)
}
  0x50   : > { %s1208_s22 = scalar_lea.vmem %s265_s21, 2048  ;;  %p1216_p5 = scmp.lt.s32.totalorder %s265_s21, %s265_s21 }
  0x51   : > { %p1209_p1 = scmp.ne.s32.totalorder %s265_s21, %s1208_s22  ;;  %p1217_p6 = scmp.lt.s32.totalorder %s1208_s22, %s1208_s22 }
  0x53   : > { %p1211_p2 = pnand %p1209_p1, %p1467_p0  ;;  %p1218_p9 = por %p1217_p6, %p1216_p5 }
  0x55   : > { %p1212_p4 = pneg %p1211_p2 }
  0x57   : > { %p1219_p11 = pnand %p1218_p9, %p1212_p4 }
  0x59   : > { %1222 = shalt.err (!%p1219_p11)
}
  0x5a   : > { %1062 = dma.hbm_to_vmem [thread:$0]  (!%p1450_p10), %s1696_s5, 2048, %s265_s21, [#allocation10], %s1344_s24, %s1344_s24, %s1345_s11  }
  0x5b   : > { %s44_s20 = sadd.s32 1, %s1329_s26  ;;  %s32_s12 = sadd.s32 1, %s1337_s28 }
  0x5c   : > { %s281_s4 = sand.u32 1, %s1329_s26   ;;  %p33_p0 = scmp.ge.s32.totalorder %s32_s12, 2 }
  0x5d   : > { %s852_s13 = sshll.u32 %s281_s4, 6  ;;  %s853_s6 = sshll.u32 %s1337_s28, 7 }
  0x5e   : > { %s1734_s12 = smov (%p33_p0, %s32_s12), 0  ;;  %s1537_s30 = scalar_lea.hbm %s1691_s0, %s853_s6 }
  0x5f   : > { %s40_s21 = ssub.s32 %s1337_s28, %s1734_s12  ;;  %s285_s15 = scalar_lea.vmem [#allocation3], %s852_s13 }
  0x60   : > { %s294_s16 = sshll.u32 %s285_s15, 4  ;;  %p42_p10 = scmp.eq.s32.totalorder %s40_s21, 0  ;;  %s1541_s16 = int_to_ptr.vmem [resolvable:$true] %s294_s16 }
  0x61   : > { %s1546_s19 = scalar_lea.sflag [#allocation4], %s281_s4  ;;  %s1223_s22 = scalar_lea.hbm %s1537_s30, 1024 }
  0x62   : > { %s1544_s17 = scalar_select %p42_p10, %s1329_s26, %s44_s20  }
  0x63   : > { %p1224_p3 = scmp.ne.s32.totalorder %s1537_s30, %s1223_s22  ;;  %p1717_p7 = scmp.ne.s32.totalorder %s1715_s14, 0 }
  0x64   : > { %s1228_s13 = scalar_lea.hbm %s1691_s0, 2048  ;;  %p1229_p1 = scmp.lt.u32.totalorder %s1537_s30, %s1691_s0 }
  0x65   : > { %p1225_p8 = pneg %p1717_p7  ;;  %p1230_p2 = scmp.lt.u32.totalorder %s1228_s13, %s1223_s22 }
  0x66   : > { %p1232_p5 = scmp.lt.u32.totalorder %s1223_s22, %s1537_s30 }
  0x67   : > { %p1226_p12 = pnand %p1225_p8, %p1224_p3  ;;  %p1231_p4 = por %p1230_p2, %p1229_p1 }
  0x69   : > { %p1227_p13 = pneg %p1226_p12  ;;  %p1233_p6 = por %p1232_p5, %p1231_p4 }
  0x6b   : > { %p1234_p9 = pnand %p1233_p6, %p1227_p13 }
  0x6d   : > { %1237 = shalt.err (!%p1234_p9)
}
  0x6e   : > { %s1238_s20 = scalar_lea.vmem %s1541_s16, 1024  ;;  %s1348_s4 = smov [#allocation3]  }
  0x6f   : > { %p1239_p11 = scmp.ne.s32.totalorder %s1541_s16, %s1238_s20  ;;  %s1243_s29 = sshll.u32 %s1348_s4, 4  ;;  %s1244_s29 = int_to_ptr.vmem [resolvable:$false] %s1243_s29 }
  0x70   : > { %s1245_s21 = scalar_lea.vmem %s1244_s29, 2048  ;;  %p1246_p3 = scmp.lt.s32.totalorder %s1541_s16, %s1244_s29 }
  0x71   : > { %p1241_p0 = pnand %p1239_p11, %p1225_p8  ;;  %p1247_p12 = scmp.lt.s32.totalorder %s1245_s21, %s1238_s20 }
  0x73   : > { %p1242_p10 = pneg %p1241_p0  ;;  %p1248_p1 = por %p1247_p12, %p1246_p3 }
  0x75   : > { %p1249_p2 = pnand %p1248_p1, %p1242_p10 }
  0x77   : > { %1252 = shalt.err (!%p1249_p2)
}
  0x78   : > { %s1349_s15 = smov 256   ;;  %p1718_p8 = scmp.ne.s32.totalorder %s1713_s10, 0 }
  0x79   : > { %1066 = dma.hbm_to_vmem [thread:$0]  (!%p1717_p7), %s1537_s30, 1024, %s1541_s16, %s1546_s19, %s1349_s15, %s1344_s24, %s1345_s11  }
  0x7a   : > { %306 = sbr.rel (%p1718_p8) target bundleno = 1179 (0x49b), region = 48  ;;  %s308_s22 = sand.u32 (!%p1718_p8), 1, %s1325_s25  }
  0x7b   : > { %s855_s18 = sshll.u32 (!%p1718_p8), %s308_s22, 6  ;;  %s309_s23 = scalar_lea.sflag (!%p1718_p8), [#allocation4], %s308_s22 }
  0x7c   : > { %s1579_s13 = scalar_lea.vmem (!%p1718_p8), [#allocation3], %s855_s18  ;;  %p1719_p13 = scmp.ne.s32.totalorder (!%p1718_p8), %s1712_s9, 0 }
  0x81   : > { %1304 = dma.done.wait (%p1719_p13), %s309_s23, 1024  }
  0x82   : > { %1306 = vsyncadd (%p1719_p13), %s309_s23, 4294966272  ;;  %p1720_p4 = scmp.ne.s32.totalorder %s1711_s8, 0 }
  0x84   : > { %1308 = dma.done.wait (%p1720_p4), [#allocation7], 2304  }
  0x85   : > { %1310 = vsyncadd (%p1720_p4), [#allocation7], 4294964992 }
  0x86   : > { %1312 = dma.done.wait (%p1720_p4), [#allocation10], 2048  }
  0x87   : > { %1314 = vsyncadd (%p1720_p4), [#allocation10], 4294965248  ;;  %p859_p7 = scmp.ne.s32.totalorder %s1333_s27, 0 }
  0x88   : > { %vm355_vm0 = vcmask (!%p859_p7), 125952   ;;  %v1350_v0 = vmov (!%p859_p7), 0.0  }
  0x89   : > { %354 = sbr.rel (%p859_p7) target bundleno = 144 (0x90), region = 68  ;;  %356 = vst.msk [vmem:[#allocation2] sm:$0xf] (!%p859_p7), %vm355_vm0, %v1350_v0 }
  0x90 PF: > { %s860_s9 = sshll.u32 %s1333_s27, 7  ;;  %v366_v1 = vlaneseq  ;;  %v359_v5 = vld [vmem:[%s1579_s13 + $0x10] sm:$0xff]  ;;  %v357_v7 = vld [vmem:[%s1579_s13] sm:$0xff]  ;;  %v360_v9 = vld [vmem:[%s1579_s13 + $0x18] sm:$0xff]  ;;  %vm413_vm2 = vcmask 130112   ;;  %vm442_vm3 = vcmask 1041409  }
  0x91   : > { %v368_v2 = vstv %s860_s9  ;;  %v358_v10 = vld [vmem:[%s1579_s13 + $0x8] sm:$0xff]  ;;  %v361_v16 = vld [vmem:[%s1579_s13 + $0x20] sm:$0xff]  ;;  %v364_v19 = vld [vmem:[%s1579_s13 + $0x38] sm:$0xff]  ;;  %vm444_vm4 = vcmask 1042434   ;;  %vm446_vm5 = vcmask 1043459   ;;  %vm450_vm6 = vcmask 125952  }
  0x92   : > { %v367_v3 = vand.u32 127, %v366_v1  ;;  %v405_v4 = vshrl.u32 %v366_v1, 7  ;;  %v362_v15 = vld [vmem:[%s1579_s13 + $0x28] sm:$0xff]  ;;  %v363_v20 = vld [vmem:[%s1579_s13 + $0x30] sm:$0xff]  ;;  %v379_v46 = vld [vmem:[#allocation2] sm:$0xf] }
  0x93   : > { %p861_p5 = scmp.ne.s32.totalorder %s1333_s27, 1 }
  0x94   : > { %v369_v6 = vadd.s32 %v368_v2, %v367_v3  ;;  %v406_v8 = vsub.s32 %v367_v3, %v405_v4  ;;  %v408_v23 = vadd.s32 4294967288, %v367_v3  ;;  %v458_v50 = vld [vmem:[#allocation6] sm:$0xff] (!%p861_p5)  ;;  %v459_v51 = vld [vmem:[#allocation6 + $0x8] sm:$0xff] (!%p861_p5)  ;;  %v1351_v52 = vmov (!%p861_p5), 0.0|0.0   ;;  %v542_v56 = vld [vmem:[#allocation8] sm:$0xff] (!%p861_p5)  ;;  %s1721_s24 = sld [smem:[#allocation17_spill]] (!%p861_p5) }
  0x95   : > { %984 = vmatprep.subr.bf16.mxu0 (!%p861_p5), %v1351_v52  ;;  %v985_v53 = vpack.c.bf16 (!%p861_p5), %v459_v51, %v458_v50  ;;  %vm1352_vm7 = vmmov (!%p861_p5), 0   ;;  %v1353_v54 = vmov (!%p861_p5), 0.0   ;;  %v543_v57 = vld [vmem:[#allocation8 + $0x8] sm:$0xff] (!%p861_p5)  ;;  %987 = vmatprep.subr.bf16.mxu1 (!%p861_p5), %v1351_v52  ;;  %v544_v60 = vld [vmem:[#allocation8 + $0x10] sm:$0xff] (!%p861_p5)  ;;  %v545_v61 = vld [vmem:[#allocation8 + $0x18] sm:$0xff] (!%p861_p5)  ;;  %vm467_vm8 = vcmask (!%p861_p5), 130048  }
  0x96   : > { %vm370_vm1 = vcmp.lt.s32.totalorder %v369_v6, 196  ;;  %v411_v24 = vsub.s32 %v408_v23, %v405_v4  ;;  %911 = vmatprep.mubr.msk.f32.mxu0 (!%p861_p5), %vm1352_vm7, %v1353_v54  ;;  %v988_v59 = vpack.c.bf16 (!%p861_p5), %v543_v57, %v542_v56  ;;  %946 = vmatprep.mubr.msk.f32.mxu1 (!%p861_p5), %vm1352_vm7, %v1353_v54  ;;  %v991_v62 = vpack.c.bf16 (!%p861_p5), %v545_v61, %v544_v60  ;;  %v546_v63 = vld [vmem:[#allocation8 + $0x20] sm:$0xff] (!%p861_p5)  ;;  %v547_v0 = vld [vmem:[#allocation8 + $0x28] sm:$0xff] (!%p861_p5)  ;;  %v548_v2 = vld [vmem:[#allocation8 + $0x30] sm:$0xff] (!%p861_p5)  ;;  %s1722_s16 = sld [smem:[#allocation18_spill]] (!%p861_p5) }
  0x97   : > { %v373_v11 = vsel %vm370_vm1, %v359_v5, 0.0  ;;  %v371_v12 = vsel %vm370_vm1, %v357_v7, 0.0  ;;  %v374_v13 = vsel %vm370_vm1, %v360_v9, 0.0  ;;  %v372_v14 = vsel %vm370_vm1, %v358_v10, 0.0  ;;  %986 = vmatpush3.bf16.msra.mxu0 (!%p861_p5), %v985_v53  ;;  %v549_v3 = vld [vmem:[#allocation8 + $0x38] sm:$0xff] (!%p861_p5)  ;;  %v550_v5 = vld [vmem:[#allocation8 + $0x40] sm:$0xff] (!%p861_p5) }
  0x98   : > { %384 = vadd.xlane.f32.xlu1 %v373_v11  ;;  %380 = vadd.xlane.f32.xlu0 %v371_v12  ;;  %v376_v17 = vsel %vm370_vm1, %v362_v15, 0.0  ;;  %v375_v18 = vsel %vm370_vm1, %v361_v16, 0.0  ;;  %v378_v21 = vsel %vm370_vm1, %v364_v19, 0.0  ;;  %v377_v22 = vsel %vm370_vm1, %v363_v20, 0.0  ;;  %v551_v6 = vld [vmem:[#allocation8 + $0x48] sm:$0xff] (!%p861_p5)  ;;  %v553_v9 = vld [vmem:[#allocation8 + $0x58] sm:$0xff] (!%p861_p5) }
  0x99   : > { %989 = vmatpush3.bf16.msra.mxu1 (!%p861_p5), %v988_v59  ;;  %1011 = vmatprep.subr.bf16.mxu0 (!%p861_p5), %v1351_v52  ;;  %v994_v1 = vpack.c.bf16 (!%p861_p5), %v547_v0, %v546_v63  ;;  %v997_v4 = vpack.c.bf16 (!%p861_p5), %v549_v3, %v548_v2  ;;  %v1000_v7 = vpack.c.bf16 (!%p861_p5), %v551_v6, %v550_v5  ;;  %v554_v11 = vld [vmem:[#allocation8 + $0x60] sm:$0xff] (!%p861_p5)  ;;  %v555_v12 = vld [vmem:[#allocation8 + $0x68] sm:$0xff] (!%p861_p5)  ;;  %v557_v15 = vld [vmem:[#allocation8 + $0x78] sm:$0xff] (!%p861_p5)  ;;  %vm730_vm9 = vcmask (!%p861_p5), 1043456  }
  0x9a   : > { %990 = vmatprep.subr.bf16.mxu1 (!%p861_p5), %v1351_v52  ;;  %v638_v19 = vld [vmem:[#allocation9 + $0x10] sm:$0xff] (!%p861_p5)  ;;  %v640_v23 = vld [vmem:[#allocation9 + $0x20] sm:$0xff] (!%p861_p5) }
  0x9c   : > { %386 = vadd.xlane.f32.xlu1 %v374_v13  ;;  %382 = vadd.xlane.f32.xlu0 %v372_v14  ;;  %v1006_v13 = vpack.c.bf16 (!%p861_p5), %v555_v12, %v554_v11  ;;  %v556_v14 = vld [vmem:[#allocation8 + $0x70] sm:$0xff] (!%p861_p5)  ;;  %v865_v51 = vld [vmem:[%s1722_s16] ss:$0 sm:$0xff] (!%p861_p5) }
  0x9d   : > { %992 = vmatpush3.bf16.msra.mxu1 (!%p861_p5), %v991_v62  ;;  %v1009_v16 = vpack.c.bf16 (!%p861_p5), %v557_v15, %v556_v14 }
  0x9e   : > { %993 = vmatprep.subr.bf16.mxu1 (!%p861_p5), %v1351_v52 }
  0xa0   : > { %390 = vadd.xlane.f32.xlu1 %v376_v17  ;;  %388 = vadd.xlane.f32.xlu0 %v375_v18  ;;  %v636_v17 = vld [vmem:[#allocation9] sm:$0xff] (!%p861_p5)  ;;  %v637_v18 = vld [vmem:[#allocation9 + $0x8] sm:$0xff] (!%p861_p5) }
  0xa1   : > { %995 = vmatpush3.bf16.msra.mxu1 (!%p861_p5), %v994_v1  ;;  %v1012_v20 = vpack.c.bf16 (!%p861_p5), %v637_v18, %v636_v17 }
  0xa2   : > { %996 = vmatprep.subr.bf16.mxu1 (!%p861_p5), %v1351_v52 }
  0xa4   : > { %394 = vadd.xlane.f32.xlu1 %v378_v21  ;;  %392 = vadd.xlane.f32.xlu0 %v377_v22  ;;  %v639_v21 = vld [vmem:[#allocation9 + $0x18] sm:$0xff] (!%p861_p5) }
  0xa5   : > { %998 = vmatpush3.bf16.msra.mxu1 (!%p861_p5), %v997_v4  ;;  %v1015_v22 = vpack.c.bf16 (!%p861_p5), %v639_v21, %v638_v19 }
  0xa6   : > { %999 = vmatprep.subr.bf16.mxu1 (!%p861_p5), %v1351_v52 }
  0xa9   : > { %1001 = vmatpush3.bf16.msra.mxu1 (!%p861_p5), %v1000_v7 }
  0xaa   : > { %1002 = vmatprep.subr.bf16.mxu1 (!%p861_p5), %v1351_v52 }
 0x125   : > { %v385_v25 = vpop.xlane.xlu1 %384  ;;  %v381_v26 = vpop.xlane.xlu0 %380 }
 0x126   : > { %v418_v29 = vrot.slane %v385_v25, %v406_v8  ;;  %v407_v30 = vrot.slane %v381_v26, %v406_v8  ;;  %v642_v26 = vld [vmem:[#allocation9 + $0x30] sm:$0xff] (!%p861_p5) }
 0x129   : > { %v387_v27 = vpop.xlane.xlu1 %386  ;;  %v383_v28 = vpop.xlane.xlu0 %382 }
 0x12a   : > { %v422_v31 = vrot.slane %v387_v27, %v411_v24  ;;  %v412_v32 = vrot.slane %v383_v28, %v411_v24  ;;  %v643_v27 = vld [vmem:[#allocation9 + $0x38] sm:$0xff] (!%p861_p5) }
 0x12b   : > { %v1021_v28 = vpack.c.bf16 (!%p861_p5), %v643_v27, %v642_v26 }
 0x12c   : > { %v423_v33 = vsel %vm413_vm2, %v422_v31, %v418_v29  ;;  %v414_v34 = vsel %vm413_vm2, %v412_v32, %v407_v30  ;;  %v644_v29 = vld [vmem:[#allocation9 + $0x40] sm:$0xff] (!%p861_p5)  ;;  %v645_v30 = vld [vmem:[#allocation9 + $0x48] sm:$0xff] (!%p861_p5)  ;;  %v646_v32 = vld [vmem:[#allocation9 + $0x50] sm:$0xff] (!%p861_p5) }
 0x12d   : > { %v443_v35 = vsel %vm442_vm3, %v423_v33, %v414_v34  ;;  %v391_v36 = vpop.xlane.xlu1 %390  ;;  %v389_v37 = vpop.xlane.xlu0 %388  ;;  %v1024_v31 = vpack.c.bf16 (!%p861_p5), %v645_v30, %v644_v29  ;;  %v647_v33 = vld [vmem:[#allocation9 + $0x58] sm:$0xff] (!%p861_p5) }
 0x12e   : > { %v431_v38 = vrot.slane %v391_v36, %v411_v24  ;;  %v427_v39 = vrot.slane %v389_v37, %v406_v8  ;;  %v1027_v34 = vpack.c.bf16 (!%p861_p5), %v647_v33, %v646_v32  ;;  %v649_v36 = vld [vmem:[#allocation9 + $0x68] sm:$0xff] (!%p861_p5) }
 0x130   : > { %v432_v40 = vsel %vm413_vm2, %v431_v38, %v427_v39  ;;  %v862_v38 = vld [vmem:[%s1693_s2] ss:$0 sm:$0xff] (!%p861_p5) }
 0x131   : > { %v445_v41 = vsel %vm444_vm4, %v432_v40, %v443_v35  ;;  %v395_v42 = vpop.xlane.xlu1 %394  ;;  %v393_v43 = vpop.xlane.xlu0 %392  ;;  %v648_v35 = vld [vmem:[#allocation9 + $0x60] sm:$0xff] (!%p861_p5) }
 0x132   : > { %v440_v44 = vrot.slane %v395_v42, %v411_v24  ;;  %v436_v45 = vrot.slane %v393_v43, %v406_v8  ;;  %455 = sbr.rel (%p861_p5) target bundleno = 1144 (0x478), region = 72  ;;  %v552_v8 = vld [vmem:[#allocation8 + $0x50] sm:$0xff] (!%p861_p5)  ;;  %v641_v24 = vld [vmem:[#allocation9 + $0x28] sm:$0xff] (!%p861_p5)  ;;  %v1030_v37 = vpack.c.bf16 (!%p861_p5), %v649_v36, %v648_v35 }
 0x133   : > { %v1003_v10 = vpack.c.bf16 (!%p861_p5), %v553_v9, %v552_v8  ;;  %v1018_v25 = vpack.c.bf16 (!%p861_p5), %v641_v24, %v640_v23  ;;  %v650_v43 = vld [vmem:[#allocation9 + $0x70] sm:$0xff] (!%p861_p5) }
 0x134   : > { %v441_v47 = vsel %vm413_vm2, %v440_v44, %v436_v45  ;;  %v651_v44 = vld [vmem:[#allocation9 + $0x78] sm:$0xff] (!%p861_p5) }
 0x135   : > { %v447_v48 = vsel %vm446_vm5, %v441_v47, %v445_v41  ;;  %1004 = vmatpush3.bf16.msra.mxu1 (!%p861_p5), %v1003_v10  ;;  %v1033_v45 = vpack.c.bf16 (!%p861_p5), %v651_v44, %v650_v43 }
 0x136   : > { %v449_v49 = vadd.f32 %v447_v48, %v379_v46  ;;  %1005 = vmatprep.subr.bf16.mxu1 (!%p861_p5), %v1351_v52  ;;  %v864_v46 = vld [vmem:[%s1721_s24] ss:$0 sm:$0xff] (!%p861_p5) }
 0x138   : > { %451 = vst.msk [vmem:[#allocation2] sm:$0xf] %vm450_vm6, %v449_v49 }
 0x139   : > { %1007 = vmatpush3.bf16.msra.mxu1 %v1006_v13 }
 0x13a   : > { %1008 = vmatprep.subr.bf16.mxu1 %v1351_v52 }
 0x13d   : > { %1010 = vmatpush3.bf16.msra.mxu1 %v1009_v16 }
 0x13f   : > { %v456_v55 = vld [vmem:[#allocation2] sm:$0xf] }
 0x140   : > { %v457_v58 = vmul.f32 0.0051020407, %v456_v55 }
 0x142   : > { %912 = vmatmul.mubr.msk.f32.vlgmr.msra.gmra.mrb[0].mxu0 %vm467_vm8, %v457_v58 }
 0x143   : > { %981 = vmatprep.mubr.msk.f32.mxu0 %vm1352_vm7, %v1353_v54  ;;  %1013 = vmatpush3.bf16.msra.mxu0 %v1012_v20 }
 0x144   : > { %1014 = vmatprep.subr.bf16.mxu0 %v1351_v52 }
 0x147   : > { %1016 = vmatpush3.bf16.msra.mxu0 %v1015_v22 }
 0x148   : > { %1017 = vmatprep.subr.bf16.mxu0 %v1351_v52 }
 0x14b   : > { %1019 = vmatpush3.bf16.msra.mxu0 %v1018_v25 }
 0x14c   : > { %1020 = vmatprep.subr.bf16.mxu0 %v1351_v52 }
 0x14f   : > { %1022 = vmatpush3.bf16.msra.mxu0 %v1021_v28 }
 0x150   : > { %1023 = vmatprep.subr.bf16.mxu0 %v1351_v52 }
 0x153   : > { %1025 = vmatpush3.bf16.msra.mxu0 %v1024_v31 }
 0x154   : > { %1026 = vmatprep.subr.bf16.mxu0 %v1351_v52 }
 0x157   : > { %1028 = vmatpush3.bf16.msra.mxu0 %v1027_v34 }
 0x158   : > { %1029 = vmatprep.subr.bf16.mxu0 %v1351_v52 }
 0x15b   : > { %1031 = vmatpush3.bf16.msra.mxu0 %v1030_v37 }
 0x15c   : > { %1032 = vmatprep.subr.bf16.mxu0 %v1351_v52 }
 0x15f   : > { %1034 = vmatpush3.bf16.msra.mxu0 %v1033_v45 }
 0x215   : > { %v537_v39 = vpop.f32.mrb[0].mxu0 }
 0x216   : > { %v538_v40 = vadd.f32 %v862_v38, %v537_v39  ;;  %v913_v41 = vpop.f32.mrb[1].mxu0 }
 0x218   : > { %v541_v42 = vmax.f32 %v538_v40, 0.0 }
 0x21a   : > { %947 = vmatmul.mubr.f32.vlgmr.msra.gmra.mrb[0].mxu1 %v541_v42 }
 0x2ed   : > { %v631_v47 = vpop.f32.mrb[0].mxu1 }
 0x2ee   : > { %v632_v48 = vadd.f32 %v864_v46, %v631_v47  ;;  %v948_v49 = vpop.f32.mrb[1].mxu1 }
 0x2f0   : > { %v635_v50 = vmax.f32 %v632_v48, 0.0 }
 0x2f2   : > { %982 = vmatmul.mubr.f32.vlgmr.msra.gmra.mrb[2].mxu0 %v635_v50 }
 0x3c5   : > { %v725_v52 = vpop.f32.mrb[2].mxu0 }
 0x3c6   : > { %v726_v53 = vadd.f32 %v865_v51, %v725_v52  ;;  %v983_v54 = vpop.f32.mrb[3].mxu0 }
 0x3c8   : > { %v729_v55 = vmul.f32 %v726_v53, %v726_v53 }
 0x3ca   : > { %v731_v56 = vsel %vm730_vm9, %v729_v55, 0.0 }
 0x3cb   : > { %732 = vadd.xlane.f32.xlu0 %v731_v56 }
 0x458   : > { %v733_v57 = vpop.xlane.xlu0 %732 }
 0x459   : > { %1135 = vrsqrt.f32 %v733_v57  ;;  %vm736_vm10 = vcmp.eq.f32.partialorder %v733_v57, inf  ;;  %v739_v60 = vand.u32 2147483648, %v733_v57  ;;  %vm738_vm11 = vcmp.eq.f32.partialorder %v733_v57, 0.0 }
 0x463   : > { %v1136_v58 = vpop.eup %1135 }
 0x464   : > { %v735_v59 = vmul.f32 %v1136_v58, %v733_v57 }
 0x466   : > { %v737_v61 = vsel %vm736_vm10, %v733_v57, %v735_v59 }
 0x467   : > { %v740_v62 = vsel %vm738_vm11, %v739_v60, %v737_v61 }
 0x468   : > { %v741_v63 = vmax.f32 %v740_v62, 1e-12 }
 0x46a   : > { %1137 = vrcp.f32 %v741_v63 }
 0x474   : > { %v1138_v0 = vpop.eup %1137 }
 0x475   : > { %v743_v1 = vmul.f32 %v1138_v0, %v726_v53 }
 0x477   : > { %744 = vst [vmem:[#allocation11] sm:$0xf] %v743_v1 }
 0x478 PF: > { %s1723_s19 = sld [smem:[#allocation16_spill]]  ;;  %s1354_s20 = smov [#allocation11]  }
 0x479   : > { %s754_s4 = sshll.u32 %s1354_s20, 4  ;;  %s755_s4 = int_to_ptr.vmem [resolvable:$true] %s754_s4 }
 0x47a   : > { %s1253_s29 = scalar_lea.vmem %s755_s4, 64  ;;  %p1260_p10 = scmp.lt.s32.totalorder %s755_s4, %s755_s4 }
 0x47b   : > { %p1254_p9 = scmp.ne.s32.totalorder %s755_s4, %s1253_s29  ;;  %p1261_p3 = scmp.lt.s32.totalorder %s1253_s29, %s1253_s29 }
 0x47d   : > { %p1262_p12 = por %p1261_p3, %p1260_p10 }
 0x47e   : > { %s1724_s6 = sadd.s32 4294967295, %s1723_s19  }
 0x47f   : > { %p1647_p6 = scmp.eq.s32.totalorder %s1724_s6, 1 }
 0x481   : > { %p1255_p11 = pnand %p1254_p9, %p1647_p6 }
 0x483   : > { %p1256_p0 = pneg %p1255_p11 }
 0x485   : > { %p1263_p1 = pnand %p1262_p12, %p1256_p0 }
 0x487   : > { %1266 = shalt.err (!%p1263_p1)
}
 0x488   : > { %s1726_s22 = sld [smem:[#allocation19_spill]] }
 0x48e   : > { %s1267_s18 = scalar_lea.hbm %s1726_s22, 64 }
 0x48f   : > { %p1268_p2 = scmp.ne.s32.totalorder %s1726_s22, %s1267_s18  ;;  %p1273_p4 = scmp.lt.u32.totalorder %s1267_s18, %s1726_s22 }
 0x491   : > { %p1269_p8 = pnand %p1268_p2, %p1647_p6 }
 0x493   : > { %p1270_p13 = pneg %p1269_p8 }
 0x495   : > { %p1275_p7 = pnand %p1273_p4, %p1270_p13 }
 0x497   : > { %1278 = shalt.err (!%p1275_p7)
}
 0x498   : > { %1050 = dma.vmem_to_hbm [thread:$0]  (%p1647_p6), %s755_s4, 64, %s1726_s22, [#allocation5]  }
 0x499   : > { %1316 = dma.done.wait (%p1647_p6), [#allocation5], 64  }
 0x49a   : > { %1318 = vsyncadd (%p1647_p6), [#allocation5], 4294967232 }
 0x49b PF: > { %s1727_s14 = sld [smem:[#allocation16_spill]]  ;;  %s1728_s24 = smov %s1325_s25 }
 0x49c   : > { %s1729_s25 = smov %s1329_s26  ;;  %s1730_s26 = smov %s1544_s17 }
 0x49d   : > { %s1731_s27 = smov %s1337_s28  ;;  %s1732_s28 = smov %s1734_s12 }
 0x4a1   : > { %s23_s29 = sadd.s32 1, %s1727_s14  }
 0x4a2   : > { %p20_p5 = scmp.ge.s32.totalorder %s23_s29, 4  }
 0x4a4   :  { %22 = sbr.rel (!%p20_p5) target bundleno = 11 (0xb), region = 106 }
 0x4ab   :  { %767 = vsyncpa [#allocation4], 1 }
 0x4ac   :  { %769 = vsyncpa [#allocation4 + $0x1], 1 }
 0x4ad   :  { %770 = vsyncpa [#allocation7], 1 }
 0x4ae   :  { %771 = vsyncpa [#allocation10], 1 }
 0x4af   :  { %772 = vsyncpa [#allocation5], 1 }
 0x4b0   :  { %774 = vsyncpa [#allocation5 + $0x1], 1 }

</bundles_post_ra>
